<compile_context>
chip_gen: v7x
topology: tpu7x:2x2x1
jax: 0.10.0
libtpu: 0.0.40
codegen_flags: <defaults>
</compile_context>

<pallas_src>
import functools
import math

import jax
import jax.numpy as jnp
from jax import lax
from jax.experimental import pallas as pl
from jax.experimental.pallas import tpu as pltpu


def _round_up(x, n):
    return ((x + n - 1) // n) * n


def _aml_kernel(lab_ref, emb_ref, wt_ref, out_ref, m_acc, s_acc, t_acc, *,
                scale, cos_m, sin_m, num_classes, num_rows,
                block_b, block_c, mask_classes, mask_rows):
    j = pl.program_id(1)

    @pl.when(j == 0)
    def _():
        m_acc[...] = jnp.full_like(m_acc, -jnp.inf)
        s_acc[...] = jnp.zeros_like(s_acc)
        t_acc[...] = jnp.zeros_like(t_acc)

    # cos_theta tile: [TB, D] @ [D, TC] -> [TB, TC] (bf16 MXU, f32 accumulate).
    cos_theta = jnp.dot(emb_ref[...], wt_ref[...],
                        preferred_element_type=jnp.float32)

    labels = lab_ref[...]                                          # [TB, 1] i32
    c0 = j * block_c
    class_ids = lax.broadcasted_iota(jnp.int32, cos_theta.shape, 1) + c0
    onehot = class_ids == labels                                   # [TB, TC]

    # Gather the target cos per row (0 if this row's target is not in tile) and
    # apply the angular margin only to that [TB, 1] value:
    #   cos(theta + m) = cos*cos_m - sqrt(max(1 - cos^2, 0))*sin_m
    cos_t = jnp.sum(jnp.where(onehot, cos_theta, 0.0), axis=-1, keepdims=True)
    cos_t = jnp.clip(cos_t, -1.0, 1.0)
    sin_t = jnp.sqrt(jnp.maximum(1.0 - cos_t * cos_t, 0.0))
    marg_t = cos_t * cos_m - sin_t * sin_m                         # [TB, 1]

    logits = scale * jnp.where(onehot, marg_t, cos_theta)          # [TB, TC]
    if mask_classes:
        logits = jnp.where(class_ids < num_classes, logits, -1e30)

    # Target-logit accumulator: only the tile containing the label contributes
    # (indicator computed from the label scalar column, no cross-lane reduce).
    in_tile = (labels >= c0) & (labels < c0 + block_c)             # [TB, 1]
    t_acc[...] += jnp.where(in_tile, scale * marg_t, 0.0)

    # Online logsumexp across class tiles.
    m_prev = m_acc[...]
    m_new = jnp.maximum(m_prev, jnp.max(logits, axis=-1, keepdims=True))
    alpha = jnp.exp(m_prev - m_new)
    s_acc[...] = alpha * s_acc[...] + jnp.sum(jnp.exp(logits - m_new),
                                              axis=-1, keepdims=True)
    m_acc[...] = m_new

    @pl.when(j == pl.num_programs(1) - 1)
    def _():
        lse = m_acc[...] + jnp.log(s_acc[...])
        per_example = lse - t_acc[...]                             # [TB, 1]
        if mask_rows:
            row_ids = (lax.broadcasted_iota(jnp.int32, per_example.shape, 0)
                       + pl.program_id(0) * block_b)
            per_example = jnp.where(row_ids < num_rows, per_example, 0.0)
        out_ref[...] = per_example


def angular_margin_loss(embeddings, weights, labels, *, m, s,
                        block_b=None, block_c=256,
                        compute_dtype=jnp.bfloat16,
                        vmem_limit_bytes=None):
    """Pallas TPU forward of AngularMarginLoss. Returns a scalar f32 loss."""
    B, D = embeddings.shape
    C, Dw = weights.shape
    assert D == Dw

    # Class tile: multiple of 128 lanes (size it down for v7x's 64 MiB VMEM).
    block_c = _round_up(min(block_c, _round_up(C, 128)), 128)
    C_pad = _round_up(C, block_c)

    # Batch tile: multiple of 16 sublanes (bf16 packing).
    if block_b is None:
        block_b = min(128, _round_up(B, 16))
    block_b = _round_up(block_b, 16)
    B_pad = _round_up(B, block_b)

    emb = embeddings.astype(compute_dtype)
    wt = weights.astype(compute_dtype).T                  # [D, C], lane-dense C
    labels_i = labels.astype(jnp.int32)

    if B_pad != B:
        emb = jnp.pad(emb, ((0, B_pad - B), (0, 0)))
        labels_i = jnp.pad(labels_i, (0, B_pad - B))
    if C_pad != C:
        wt = jnp.pad(wt, ((0, 0), (0, C_pad - C)))
    labels2d = labels_i.reshape(B_pad, 1)

    grid = (B_pad // block_b, C_pad // block_c)

    kernel = functools.partial(
        _aml_kernel,
        scale=float(s),
        cos_m=math.cos(float(m)),
        sin_m=math.sin(float(m)),
        num_classes=C,
        num_rows=B,
        block_b=block_b,
        block_c=block_c,
        mask_classes=(C_pad != C),
        mask_rows=(B_pad != B),
    )

    grid_spec = pltpu.PrefetchScalarGridSpec(
        num_scalar_prefetch=0,
        grid=grid,
        in_specs=[
            pl.BlockSpec((block_b, 1), lambda i, j: (i, 0)),      # labels
            pl.BlockSpec((block_b, D), lambda i, j: (i, 0)),      # embeddings
            pl.BlockSpec((D, block_c), lambda i, j: (0, j)),      # weights^T
        ],
        out_specs=pl.BlockSpec((block_b, 1), lambda i, j: (i, 0)),
        scratch_shapes=[pltpu.VMEM((block_b, 1), jnp.float32)] * 3,
    )

    per_example = pl.pallas_call(
        kernel,
        out_shape=jax.ShapeDtypeStruct((B_pad, 1), jnp.float32),
        grid_spec=grid_spec,
        compiler_params=pltpu.CompilerParams(
            dimension_semantics=("parallel", "arbitrary"),
            vmem_limit_bytes=vmem_limit_bytes),
    )(labels2d, emb, wt)

    # Tiny epilogue: mean over B per-example losses (padded rows are zeroed).
    return jnp.sum(per_example) * (1.0 / B)


def _reference_loss(embeddings, weights, labels, *, m, s, num_classes):
    cos_theta = embeddings.astype(jnp.float32) @ weights.astype(jnp.float32).T
    theta = jnp.arccos(cos_theta)
    margin = m * jax.nn.one_hot(labels, num_classes, dtype=jnp.float32)
    logits = s * jnp.cos(theta + margin)
    logp = jax.nn.log_softmax(logits, axis=-1)
    return -jnp.mean(jnp.take_along_axis(logp, labels[:, None], axis=-1))


if __name__ == "__main__":
    # Module hyper-parameters (deterministic, from __init__).
    m = 0.5
    s = 30.0
    number_of_classes = 512

    # Small deterministic inputs.  ArcFace assumes L2-normalized embeddings and
    # class weights so cos_theta lies in [-1, 1].
    B, D, C = 32, 128, number_of_classes
    key = jax.random.PRNGKey(0)
    k_e, k_w, k_l = jax.random.split(key, 3)
    embeddings = jax.random.normal(k_e, (B, D), dtype=jnp.float32)
    embeddings = embeddings / jnp.linalg.norm(embeddings, axis=-1, keepdims=True)
    weights = jax.random.normal(k_w, (C, D), dtype=jnp.float32)
    weights = weights / jnp.linalg.norm(weights, axis=-1, keepdims=True)
    labels = jax.random.randint(k_l, (B,), 0, C, dtype=jnp.int32)

    loss = angular_margin_loss(embeddings, weights, labels, m=m, s=s,
                               block_b=16, block_c=256)
    loss = jax.block_until_ready(loss)

    # Reference computed on the same bf16-quantized inputs the kernel streams.
    emb_q = embeddings.astype(jnp.bfloat16).astype(jnp.float32)
    w_q = weights.astype(jnp.bfloat16).astype(jnp.float32)
    ref = _reference_loss(emb_q, w_q, labels, m=m, s=s,
                          num_classes=number_of_classes)

    assert jnp.allclose(loss, ref, rtol=2e-3, atol=2e-3), (loss, ref)

    print("KERNEL_OK")
</pallas_src>

<mosaic_0001>
module attributes {stable_mosaic.version = 11 : i64} {
  func.func @_aml_kernel(%arg0: i32, %arg1: i32, %arg2: memref<16x1xi32, #tpu.memory_space<vmem>>, %arg3: memref<16x128xbf16, #tpu.memory_space<vmem>>, %arg4: memref<128x256xbf16, #tpu.memory_space<vmem>>, %arg5: memref<16x1xf32, #tpu.memory_space<vmem>>, %arg6: memref<16x1xf32, #tpu.memory_space<vmem>>, %arg7: memref<16x1xf32, #tpu.memory_space<vmem>>, %arg8: memref<16x1xf32, #tpu.memory_space<vmem>>) attributes {dimension_semantics = [#tpu.dimension_semantics<parallel>, #tpu.dimension_semantics<arbitrary>], iteration_bounds = array<i64: 2, 2>, scalar_prefetch = 0 : i64, scratch_operands = 3 : i64, tpu.core_type = #tpu.core_type<tc>, window_params = [{transform_indices = @transform_0, window_bounds = array<i64: 16, 1>}, {transform_indices = @transform_1, window_bounds = array<i64: 16, 128>}, {transform_indices = @transform_2, window_bounds = array<i64: 128, 256>}, {transform_indices = @transform_3, window_bounds = array<i64: 16, 1>}]} {
    %c0_i32 = arith.constant 0 : i32
    %0 = arith.cmpi eq, %arg1, %c0_i32 : i32
    %1 = arith.extui %0 : i1 to i32
    %c0_i32_0 = arith.constant 0 : i32
    %2 = arith.cmpi ne, %1, %c0_i32_0 : i32
    scf.if %2 {
      %cst_33 = arith.constant 0xFF800000 : f32
      %69 = vector.broadcast %cst_33 : f32 to vector<16x1xf32>
      %c0_34 = arith.constant 0 : index
      %c0_35 = arith.constant 0 : index
      %70 = vector.load %arg6[%c0_34, %c0_35] : memref<16x1xf32, #tpu.memory_space<vmem>>, vector<16x1xf32>
      tpu.vector_store %arg6[%c0_34, %c0_35], %69 {strides = array<i32>} : memref<16x1xf32, #tpu.memory_space<vmem>>, vector<16x1xf32>,
      %cst_36 = arith.constant 0.000000e+00 : f32
      %71 = vector.broadcast %cst_36 : f32 to vector<16x1xf32>
      %c0_37 = arith.constant 0 : index
      %c0_38 = arith.constant 0 : index
      %72 = vector.load %arg7[%c0_37, %c0_38] : memref<16x1xf32, #tpu.memory_space<vmem>>, vector<16x1xf32>
      tpu.vector_store %arg7[%c0_37, %c0_38], %71 {strides = array<i32>} : memref<16x1xf32, #tpu.memory_space<vmem>>, vector<16x1xf32>,
      %cst_39 = arith.constant 0.000000e+00 : f32
      %73 = vector.broadcast %cst_39 : f32 to vector<16x1xf32>
      %c0_40 = arith.constant 0 : index
      %c0_41 = arith.constant 0 : index
      %74 = vector.load %arg8[%c0_40, %c0_41] : memref<16x1xf32, #tpu.memory_space<vmem>>, vector<16x1xf32>
      tpu.vector_store %arg8[%c0_40, %c0_41], %73 {strides = array<i32>} : memref<16x1xf32, #tpu.memory_space<vmem>>, vector<16x1xf32>,
    } else {
    }
    %c0 = arith.constant 0 : index
    %c0_1 = arith.constant 0 : index
    %3 = vector.load %arg3[%c0, %c0_1] : memref<16x128xbf16, #tpu.memory_space<vmem>>, vector<16x128xbf16>
    %c0_2 = arith.constant 0 : index
    %c0_3 = arith.constant 0 : index
    %4 = vector.load %arg4[%c0_2, %c0_3] : memref<128x256xbf16, #tpu.memory_space<vmem>>, vector<128x256xbf16>
    %cst = arith.constant dense<0.000000e+00> : vector<16x256xf32>
    %5 = tpu.matmul %3, %4, %cst {dimension_numbers = #tpu.dot_dimension_numbers<[1], [0], [0], [1], [0, 0, 1, 1], [], []>} : vector<16x128xbf16>, vector<128x256xbf16>, vector<16x256xf32> -> vector<16x256xf32>
    %c0_4 = arith.constant 0 : index
    %c0_5 = arith.constant 0 : index
    %6 = vector.load %arg2[%c0_4, %c0_5] : memref<16x1xi32, #tpu.memory_space<vmem>>, vector<16x1xi32>
    %c256_i32 = arith.constant 256 : i32
    %7 = arith.muli %arg1, %c256_i32 : i32
    %8 = tpu.iota {dimensions = array<i32: 1>} : vector<16x256xi32>
    %9 = vector.broadcast %7 : i32 to vector<16x256xi32>
    %10 = arith.addi %8, %9 : vector<16x256xi32>
    %11 = vector.broadcast %6 : vector<16x1xi32> to vector<16x256xi32>
    %12 = arith.cmpi eq, %10, %11 : vector<16x256xi32>
    %cst_6 = arith.constant 0.000000e+00 : f32
    %13 = vector.broadcast %cst_6 : f32 to vector<16x256xf32>
    %14 = arith.select %12, %5, %13 : vector<16x256xi1>, vector<16x256xf32>
    %cst_7 = arith.constant dense<0.000000e+00> : vector<16xf32>
    %15 = vector.multi_reduction <add>, %14, %cst_7 [1] : vector<16x256xf32> to vector<16xf32>
    %16 = vector.shape_cast %15 : vector<16xf32> to vector<16x1xf32>
    %cst_8 = arith.constant -1.000000e+00 : f32
    %cst_9 = arith.constant 1.000000e+00 : f32
    %17 = vector.broadcast %cst_8 : f32 to vector<16x1xf32>
    %18 = arith.maximumf %17, %16 : vector<16x1xf32>
    %19 = vector.broadcast %cst_9 : f32 to vector<16x1xf32>
    %20 = arith.minimumf %19, %18 : vector<16x1xf32>
    %21 = arith.mulf %20, %20 : vector<16x1xf32>
    %cst_10 = arith.constant 1.000000e+00 : f32
    %22 = vector.broadcast %cst_10 : f32 to vector<16x1xf32>
    %23 = arith.subf %22, %21 : vector<16x1xf32>
    %cst_11 = arith.constant 0.000000e+00 : f32
    %24 = vector.broadcast %cst_11 : f32 to vector<16x1xf32>
    %25 = arith.maximumf %23, %24 : vector<16x1xf32>
    %26 = math.sqrt %25 : vector<16x1xf32>
    %cst_12 = arith.constant 0.87758255 : f32
    %27 = vector.broadcast %cst_12 : f32 to vector<16x1xf32>
    %28 = arith.mulf %20, %27 : vector<16x1xf32>
    %cst_13 = arith.constant 0.47942555 : f32
    %29 = vector.broadcast %cst_13 : f32 to vector<16x1xf32>
    %30 = arith.mulf %26, %29 : vector<16x1xf32>
    %31 = arith.subf %28, %30 : vector<16x1xf32>
    %32 = vector.shape_cast %31 : vector<16x1xf32> to vector<16x1xf32>
    %33 = vector.broadcast %32 : vector<16x1xf32> to vector<16x256xf32>
    %34 = arith.select %12, %33, %5 : vector<16x256xi1>, vector<16x256xf32>
    %cst_14 = arith.constant 3.000000e+01 : f32
    %35 = vector.broadcast %cst_14 : f32 to vector<16x256xf32>
    %36 = arith.mulf %35, %34 : vector<16x256xf32>
    %37 = vector.broadcast %7 : i32 to vector<16x1xi32>
    %38 = arith.cmpi sge, %6, %37 : vector<16x1xi32>
    %c256_i32_15 = arith.constant 256 : i32
    %39 = arith.addi %7, %c256_i32_15 : i32
    %40 = vector.broadcast %39 : i32 to vector<16x1xi32>
    %41 = arith.cmpi slt, %6, %40 : vector<16x1xi32>
    %42 = arith.andi %38, %41 : vector<16x1xi1>
    %c0_16 = arith.constant 0 : index
    %c0_17 = arith.constant 0 : index
    %43 = vector.load %arg8[%c0_16, %c0_17] : memref<16x1xf32, #tpu.memory_space<vmem>>, vector<16x1xf32>
    %cst_18 = arith.constant 3.000000e+01 : f32
    %44 = vector.broadcast %cst_18 : f32 to vector<16x1xf32>
    %45 = arith.mulf %44, %31 : vector<16x1xf32>
    %cst_19 = arith.constant 0.000000e+00 : f32
    %46 = vector.broadcast %cst_19 : f32 to vector<16x1xf32>
    %47 = arith.select %42, %45, %46 : vector<16x1xi1>, vector<16x1xf32>
    %48 = arith.addf %43, %47 : vector<16x1xf32>
    %c0_20 = arith.constant 0 : index
    %c0_21 = arith.constant 0 : index
    %49 = vector.load %arg8[%c0_20, %c0_21] : memref<16x1xf32, #tpu.memory_space<vmem>>, vector<16x1xf32>
    tpu.vector_store %arg8[%c0_20, %c0_21], %48 {strides = array<i32>} : memref<16x1xf32, #tpu.memory_space<vmem>>, vector<16x1xf32>,
    %c0_22 = arith.constant 0 : index
    %c0_23 = arith.constant 0 : index
    %50 = vector.load %arg6[%c0_22, %c0_23] : memref<16x1xf32, #tpu.memory_space<vmem>>, vector<16x1xf32>
    %cst_24 = arith.constant dense<0xFF800000> : vector<16xf32>
    %51 = vector.multi_reduction <maximumf>, %36, %cst_24 [1] : vector<16x256xf32> to vector<16xf32>
    %52 = vector.shape_cast %51 : vector<16xf32> to vector<16x1xf32>
    %53 = arith.maximumf %50, %52 : vector<16x1xf32>
    %54 = arith.subf %50, %53 : vector<16x1xf32>
    %55 = math.exp %54 : vector<16x1xf32>
    %c0_25 = arith.constant 0 : index
    %c0_26 = arith.constant 0 : index
    %56 = vector.load %arg7[%c0_25, %c0_26] : memref<16x1xf32, #tpu.memory_space<vmem>>, vector<16x1xf32>
    %57 = arith.mulf %55, %56 : vector<16x1xf32>
    %58 = vector.broadcast %53 : vector<16x1xf32> to vector<16x256xf32>
    %59 = arith.subf %36, %58 : vector<16x256xf32>
    %60 = math.exp %59 : vector<16x256xf32>
    %cst_27 = arith.constant dense<0.000000e+00> : vector<16xf32>
    %61 = vector.multi_reduction <add>, %60, %cst_27 [1] : vector<16x256xf32> to vector<16xf32>
    %62 = vector.shape_cast %61 : vector<16xf32> to vector<16x1xf32>
    %63 = arith.addf %57, %62 : vector<16x1xf32>
    %c0_28 = arith.constant 0 : index
    %c0_29 = arith.constant 0 : index
    %64 = vector.load %arg7[%c0_28, %c0_29] : memref<16x1xf32, #tpu.memory_space<vmem>>, vector<16x1xf32>
    tpu.vector_store %arg7[%c0_28, %c0_29], %63 {strides = array<i32>} : memref<16x1xf32, #tpu.memory_space<vmem>>, vector<16x1xf32>,
    %c0_30 = arith.constant 0 : index
    %c0_31 = arith.constant 0 : index
    %65 = vector.load %arg6[%c0_30, %c0_31] : memref<16x1xf32, #tpu.memory_space<vmem>>, vector<16x1xf32>
    tpu.vector_store %arg6[%c0_30, %c0_31], %53 {strides = array<i32>} : memref<16x1xf32, #tpu.memory_space<vmem>>, vector<16x1xf32>,
    %c1_i32 = arith.constant 1 : i32
    %66 = arith.cmpi eq, %arg1, %c1_i32 : i32
    %67 = arith.extui %66 : i1 to i32
    %c0_i32_32 = arith.constant 0 : i32
    %68 = arith.cmpi ne, %67, %c0_i32_32 : i32
    scf.if %68 {
      %c0_33 = arith.constant 0 : index
      %c0_34 = arith.constant 0 : index
      %69 = vector.load %arg6[%c0_33, %c0_34] : memref<16x1xf32, #tpu.memory_space<vmem>>, vector<16x1xf32>
      %c0_35 = arith.constant 0 : index
      %c0_36 = arith.constant 0 : index
      %70 = vector.load %arg7[%c0_35, %c0_36] : memref<16x1xf32, #tpu.memory_space<vmem>>, vector<16x1xf32>
      %71 = math.log %70 : vector<16x1xf32>
      %72 = arith.addf %69, %71 : vector<16x1xf32>
      %c0_37 = arith.constant 0 : index
      %c0_38 = arith.constant 0 : index
      %73 = vector.load %arg8[%c0_37, %c0_38] : memref<16x1xf32, #tpu.memory_space<vmem>>, vector<16x1xf32>
      %74 = arith.subf %72, %73 : vector<16x1xf32>
      %c0_39 = arith.constant 0 : index
      %c0_40 = arith.constant 0 : index
      %75 = vector.load %arg5[%c0_39, %c0_40] : memref<16x1xf32, #tpu.memory_space<vmem>>, vector<16x1xf32>
      tpu.vector_store %arg5[%c0_39, %c0_40], %74 {strides = array<i32>} : memref<16x1xf32, #tpu.memory_space<vmem>>, vector<16x1xf32>,
    } else {
    }
    return
  }
  func.func @transform_0(%arg0: i32, %arg1: i32) -> (i32, i32) {
    %c0_i32 = arith.constant 0 : i32
    %c0_i32_0 = arith.constant 0 : i32
    return %arg0, %c0_i32 : i32, i32
  }
  func.func @transform_1(%arg0: i32, %arg1: i32) -> (i32, i32) {
    %c0_i32 = arith.constant 0 : i32
    %c0_i32_0 = arith.constant 0 : i32
    return %arg0, %c0_i32 : i32, i32
  }
  func.func @transform_2(%arg0: i32, %arg1: i32) -> (i32, i32) {
    %c0_i32 = arith.constant 0 : i32
    %c0_i32_0 = arith.constant 0 : i32
    return %c0_i32, %arg1 : i32, i32
  }
  func.func @transform_3(%arg0: i32, %arg1: i32) -> (i32, i32) {
    %c0_i32 = arith.constant 0 : i32
    %c0_i32_0 = arith.constant 0 : i32
    return %arg0, %c0_i32 : i32, i32
  }
}

</mosaic_0001>

<bundles_post_ra>
// kernel: tpu_custom_call.1
= control target key start
LH: loop header
LB: loop body
LE: loop exit
PB: predicated region body
PF: predicated region fallthrough
CT: control target
= control target key end

     0   :  { %8 = vsyncpa [#allocation6], 0  ;;  %s1195_s0 = inlined_call_operand.vmem [shape: s32[32,1], index: 0, kind: input, shape index: {}]   ;;  %s1196_s1 = inlined_call_operand.vmem [shape: bf16[32,128], index: 1, kind: input, shape index: {}]   ;;  %s1197_s2 = inlined_call_operand.hbm [shape: bf16[128,512], index: 2, kind: input, shape index: {}]   ;;  %s1198_s3 = inlined_call_operand.vmem [shape: f32[32,1], index: 3, kind: output, shape index: {}]  }
   0x1   :  { %10 = vsyncpa [#allocation6 + $0x1], 0  ;;  %s960_s12 = smov 0   ;;  %s962_s13 = smov 0  }
   0x2   :  { %s964_s14 = smov 0   ;;  %s966_s15 = smov 0  }
   0x3   :  { %s968_s16 = smov 0   ;;  %s970_s17 = smov 0  }
   0x4   :  { %s972_s18 = smov 0   ;;  %s974_s19 = smov 0  }
   0x5 LB: > { %s671_s20 = sadd.s32 4294967295, %s931_s19   ;;  %s25_s21 = sadd.s32 1, %s923_s17  ;;  %s931_s19 = sphi %s974_s19, %s16_s19   ;;  %s927_s18 = sphi %s972_s18, %s1213_s18   ;;  %s923_s17 = sphi %s970_s17, %s1212_s17   ;;  %s919_s16 = sphi %s968_s16, %s1211_s16   ;;  %s915_s15 = sphi %s966_s15, %s1210_s15   ;;  %s911_s14 = sphi %s964_s14, %s1209_s14   ;;  %s907_s13 = sphi %s962_s13, %s1208_s13   ;;  %s903_s12 = sphi %s960_s12, %s1207_s12  }
   0x6   : > { %p26_p0 = scmp.ge.s32.totalorder %s25_s21, 2  ;;  %s28_s22 = sadd.s32 1, %s927_s18 }
   0x7   : > { %s87_s23 = sadd.s32 1, %s911_s14  ;;  %p94_p1 = scmp.ne.s32.totalorder %s911_s14, %s907_s13 }
   0x8   : > { %s1215_s21 = smov (%p26_p0, %s25_s21), 0  ;;  %s1217_s22 = smov (!%p26_p0, %s28_s22), %s927_s18 }
   0x9   : > { %s84_s24 = ssub.s32 %s923_s17, %s1215_s21  ;;  %p95_p2 = scmp.eq.s32.totalorder %s931_s19, 0 }
   0xa   : > { %p30_p3 = scmp.ge.s32.totalorder %s1217_s22, 2  ;;  %p85_p4 = scmp.eq.s32.totalorder %s84_s24, 0 }
   0xb   : > { %p1010_p5 = por %p95_p2, %p94_p1  ;;  %p100_p6 = scmp.ne.s32.totalorder %s907_s13, %s903_s12 }
   0xc   : > { %s1219_s22 = smov (%p30_p3, %s1217_s22), 0  ;;  %p101_p7 = scmp.eq.s32.totalorder %s671_s20, 0 }
   0xd   : > { %s1018_s26 = scalar_select %p85_p4, %s911_s14, %s87_s23  }
   0xe   : > { %p717_p8 = scmp.lt.s32.totalorder %s931_s19, 4  ;;  %s168_s27 = sand.u32 1, %s911_s14  }
   0xf   : > { %p1022_p9 = por %p101_p7, %p100_p6  ;;  %s675_s29 = sshll.u32 %s168_s27, 7 }
  0x10   : > { %s710_s30 = sshll.u32 %s923_s17, 7  ;;  %s172_s7 = scalar_lea.vmem [#allocation5], %s675_s29 }
  0x11   : > { %s1030_s6 = scalar_lea.hbm %s1197_s2, %s710_s30  ;;  %s179_s8 = sshll.u32 %s172_s7, 4  ;;  %s1038_s8 = int_to_ptr.vmem [resolvable:$true] %s179_s8 }
  0x12   : > { %p1034_p10 = pnand %p717_p8, %p1010_p5  ;;  %s1041_s10 = scalar_lea.sflag [#allocation6], %s168_s27 }
  0x13   : > { %s835_s11 = scalar_lea.hbm %s1030_s6, 2048  ;;  %s840_s23 = scalar_lea.hbm %s1197_s2, 4096 }
  0x14   : > { %p836_p12 = scmp.ne.s32.totalorder %s1030_s6, %s835_s11  ;;  %p837_p13 = pneg %p1034_p10 }
  0x15   : > { %p841_p2 = scmp.lt.u32.totalorder %s1030_s6, %s1197_s2  ;;  %p842_p3 = scmp.lt.u32.totalorder %s840_s23, %s835_s11 }
  0x16   : > { %p838_p0 = pnand %p837_p13, %p836_p12  ;;  %p844_p5 = scmp.lt.u32.totalorder %s835_s11, %s1030_s6 }
  0x17   : > { %p843_p4 = por %p842_p3, %p841_p2 }
  0x18   : > { %p839_p1 = pneg %p838_p0 }
  0x19   : > { %p845_p6 = por %p844_p5, %p843_p4 }
  0x1b   : > { %p846_p7 = pnand %p845_p6, %p839_p1 }
  0x1d   : > { %849 = shalt.err (!%p846_p7)
}
  0x1e   : > { %s850_s27 = scalar_lea.vmem %s1038_s8, 2048  ;;  %s933_s29 = smov [#allocation5]  }
  0x1f   : > { %p851_p8 = scmp.ne.s32.totalorder %s1038_s8, %s850_s27  ;;  %s855_s30 = sshll.u32 %s933_s29, 4  ;;  %s856_s30 = int_to_ptr.vmem [resolvable:$false] %s855_s30 }
  0x20   : > { %s857_s4 = scalar_lea.vmem %s856_s30, 4096  ;;  %p858_p11 = scmp.lt.s32.totalorder %s1038_s8, %s856_s30 }
  0x21   : > { %p853_p12 = pnand %p851_p8, %p837_p13  ;;  %p859_p2 = scmp.lt.s32.totalorder %s857_s4, %s850_s27 }
  0x23   : > { %p854_p0 = pneg %p853_p12  ;;  %p860_p3 = por %p859_p2, %p858_p11 }
  0x25   : > { %p861_p4 = pnand %p860_p3, %p854_p0 }
  0x27   : > { %864 = shalt.err (!%p861_p4)
}
  0x28   : > { %s934_s5 = smov 256   ;;  %s935_s7 = smov 128  }
  0x29   : > { %s936_s11 = smov 8   ;;  %p187_p13 = scmp.lt.s32.totalorder %s931_s19, 5 }
  0x2a   : > { %716 = dma.hbm_to_vmem [thread:$0]  (!%p1034_p10), %s1030_s6, 2048, %s1038_s8, %s1041_s10, %s934_s5, %s935_s7, %s936_s11  }
  0x2b   : > { %p1202_p1 = scmp.ge.s32.totalorder %s931_s19, 1 }
  0x2d   : > { %p188_p5 = pnand %p1202_p1, %p187_p13 }
  0x2e   : > { %s193_s12 = sand.u32 (!%p188_p5), 1, %s907_s13  }
  0x2f   : > { %191 = sbr.rel (%p188_p5) target bundleno = 952 (0x3b8), region = 32  ;;  %s679_s20 = sshll.u32 (!%p188_p5), %s193_s12, 7 }
  0x30   : > { %s194_s23 = scalar_lea.sflag (!%p188_p5), [#allocation6], %s193_s12  ;;  %s1073_s24 = scalar_lea.vmem (!%p188_p5), [#allocation5], %s679_s20 }
  0x36   : > { %898 = dma.done.wait (%p1022_p9), %s194_s23, 2048  }
  0x37   : > { %900 = vsyncadd (%p1022_p9), %s194_s23, 4294965248  ;;  %s680_s25 = sshll.u32 %s919_s16, 1  ;;  %p686_p9 = scmp.ne.s32.totalorder %s915_s15, 0 }
  0x38   : > { %p231_p11 = scmp.lt.s32.totalorder %s680_s25, 3  ;;  %vm254_vm0 = vcmask (!%p686_p9), 7168   ;;  %v937_v0 = vmov (!%p686_p9), -inf   ;;  %v938_v1 = vmov (!%p686_p9), 0.0  }
  0x39   : > { %253 = sbr.rel (%p686_p9) target bundleno = 64 (0x40), region = 40  ;;  %255 = vst.msk [vmem:[#allocation2] sm:$0xff] (!%p686_p9), %vm254_vm0, %v937_v0  ;;  %256 = vst.msk [vmem:[#allocation2 + $0x8] sm:$0xff] (!%p686_p9), %vm254_vm0, %v937_v0 }
  0x3a   : > { %s1221_s25 = smov (!%p231_p11, %s680_s25), 3  ;;  %257 = vst.msk [vmem:[#allocation3] sm:$0xff] (!%p686_p9), %vm254_vm0, %v938_v1  ;;  %258 = vst.msk [vmem:[#allocation3 + $0x8] sm:$0xff] (!%p686_p9), %vm254_vm0, %v938_v1 }
  0x3b   : > { %s681_s6 = sshll.u32 %s1221_s25, 3  ;;  %s683_s8 = sshll.u32 %s1221_s25, 2  ;;  %259 = vst.msk [vmem:[#allocation4] sm:$0xff] (!%p686_p9), %vm254_vm0, %v938_v1  ;;  %260 = vst.msk [vmem:[#allocation4 + $0x8] sm:$0xff] (!%p686_p9), %vm254_vm0, %v938_v1 }
  0x3c   : > { %s1083_s27 = scalar_lea.vmem %s1195_s0, %s681_s6  ;;  %s1088_s4 = scalar_lea.vmem %s1196_s1, %s683_s8 }
  0x3d   : > { %s1093_s28 = scalar_lea.vmem %s1198_s3, %s681_s6 }
  0x40 PF: > { %v790_v2 = vld [vmem:[%s1073_s24 + $0x4] ss:$8 sps:$4 sm:$0xff]   ;;  %v792_v3 = vld [vmem:[%s1073_s24] ss:$8 sps:$4 sm:$0xff]   ;;  %v939_v4 = vmov 0   ;;  %s704_s16 = sshll.u32 %s915_s15, 8  ;;  %v411_v26 = vlaneseq }
  0x41   : > { %397 = vmatprep.mubr.bf16.mxu0 %v939_v4  ;;  %788 = vset.pattern.permute.xlu0 %v939_v4  ;;  %v793_v5 = vld [vmem:[%s1073_s24 + $0x14] ss:$8 sps:$4 sm:$0xff]   ;;  %v795_v6 = vld [vmem:[%s1073_s24 + $0x10] ss:$8 sps:$4 sm:$0xff]   ;;  %v796_v7 = vld [vmem:[%s1073_s24 + $0x24] ss:$8 sps:$4 sm:$0xff]   ;;  %v414_v13 = vstv %s704_s16 }
  0x42   : > { %365 = vmatprep.subr.bf16.mxu0 %v790_v2  ;;  %789 = vset.pattern.permute.xlu1 %v939_v4  ;;  %s477_s11 = sadd.s32 256, %s704_s16  ;;  %v798_v8 = vld [vmem:[%s1073_s24 + $0x20] ss:$8 sps:$4 sm:$0xff]   ;;  %v799_v9 = vld [vmem:[%s1073_s24 + $0x34] ss:$8 sps:$4 sm:$0xff]   ;;  %v412_v27 = vand.u32 127, %v411_v26 }
  0x43   : > { %366 = vmatpush1.bf16.msra.mxu0 %v792_v3  ;;  %v478_v10 = vstv %s477_s11  ;;  %v801_v11 = vld [vmem:[%s1073_s24 + $0x30] ss:$8 sps:$4 sm:$0xff]   ;;  %v802_v14 = vld [vmem:[%s1073_s24 + $0x44] ss:$8 sps:$4 sm:$0xff]   ;;  %v804_v18 = vld [vmem:[%s1073_s24 + $0x40] ss:$8 sps:$4 sm:$0xff]  }
  0x44   : > { %367 = vmatprep.subr.bf16.mxu0 %v793_v5  ;;  %v408_v12 = vld [vmem:[%s1083_s27] sm:$0xff]  ;;  %v409_v15 = vld [vmem:[%s1083_s27 + $0x8] sm:$0xff]  ;;  %v808_v21 = vld [vmem:[%s1073_s24 + $0x64] ss:$8 sps:$4 sm:$0xff]   ;;  %v413_v28 = vadd.s32 128, %v412_v27  ;;  %v1124_v30 = vadd.s32 %v414_v13, %v412_v27  ;;  %vm491_vm15 = vcmask 7168  }
  0x45   : > { %vm475_vm1 = vcmp.ge.s32.totalorder %v408_v12, %v414_v13  ;;  %vm479_vm2 = vcmp.lt.s32.totalorder %v408_v12, %v478_v10  ;;  %418 = vperm.xlu0 %788, %v408_v12   ;;  %vm476_vm4 = vcmp.ge.s32.totalorder %v409_v15, %v414_v13  ;;  %vm480_vm5 = vcmp.lt.s32.totalorder %v409_v15, %v478_v10  ;;  %v805_v19 = vld [vmem:[%s1073_s24 + $0x54] ss:$8 sps:$4 sm:$0xff]   ;;  %v807_v20 = vld [vmem:[%s1073_s24 + $0x50] ss:$8 sps:$4 sm:$0xff]   ;;  %v810_v22 = vld [vmem:[%s1073_s24 + $0x60] ss:$8 sps:$4 sm:$0xff]  }
  0x46   : > { %vm1108_vm3 = vmand %vm475_vm1, %vm479_vm2  ;;  %v811_v23 = vld [vmem:[%s1073_s24 + $0x74] ss:$8 sps:$4 sm:$0xff]   ;;  %v813_v24 = vld [vmem:[%s1073_s24 + $0x70] ss:$8 sps:$4 sm:$0xff]   ;;  %v1126_v31 = vadd.s32 %v414_v13, %v413_v28  ;;  %p707_p10 = scmp.ne.s32.totalorder %s915_s15, 1 }
  0x47   : > { %368 = vmatpush1.bf16.msra.mxu0 %v795_v6  ;;  %vm1112_vm6 = vmand %vm476_vm4, %vm480_vm5  ;;  %v814_v25 = vld [vmem:[%s1088_s4] sm:$0xff]   ;;  %v495_v28 = vld [vmem:[#allocation2 + $0x8] sm:$0xff] }
  0x48   : > { %369 = vmatprep.subr.bf16.mxu0 %v796_v7  ;;  %v483_v1 = vld [vmem:[#allocation4] sm:$0xff] }
  0x49   : > { %421 = vperm.xlu0 %788, %v409_v15  }
  0x4b   : > { %370 = vmatpush1.bf16.msra.mxu0 %v798_v8 }
  0x4c   : > { %371 = vmatprep.subr.bf16.mxu0 %v799_v9 }
  0x4f   : > { %372 = vmatpush1.bf16.msra.mxu0 %v801_v11 }
  0x50   : > { %373 = vmatprep.subr.bf16.mxu0 %v802_v14  ;;  %v484_v14 = vld [vmem:[#allocation4 + $0x8] sm:$0xff] }
  0x53   : > { %374 = vmatpush1.bf16.msra.mxu0 %v804_v18 }
  0x54   : > { %375 = vmatprep.subr.bf16.mxu0 %v805_v19 }
  0x57   : > { %376 = vmatpush1.bf16.msra.mxu0 %v807_v20 }
  0x58   : > { %377 = vmatprep.subr.bf16.mxu0 %v808_v21 }
  0x5b   : > { %378 = vmatpush1.bf16.msra.mxu0 %v810_v22 }
  0x5c   : > { %379 = vmatprep.subr.bf16.mxu0 %v811_v23 }
  0x5f   : > { %380 = vmatpush1.bf16.msra.mxu0 %v813_v24  ;;  %v494_v24 = vld [vmem:[#allocation2] sm:$0xff] }
  0x62   : > { %398 = vmatmul.mubr.bf16.vlgmr.msra.gmra.mrb[0].mxu0 %v814_v25 }
  0xc4   : > { %v419_v29 = vpop.permute.xlu0 %418 }
  0xc5   : > { %vm423_vm7 = vcmp.eq.s32.totalorder %v1124_v30, %v419_v29  ;;  %vm424_vm8 = vcmp.eq.s32.totalorder %v1126_v31, %v419_v29 }
  0xc8   : > { %v1128_v32 = vpop.permute.xlu0 %421 }
  0xc9   : > { %vm425_vm9 = vcmp.eq.s32.totalorder %v1124_v30, %v1128_v32  ;;  %vm426_vm10 = vcmp.eq.s32.totalorder %v1126_v31, %v1128_v32 }
 0x135   : > { %v399_v33 = vpop.f32.mrb[0].mxu0 }
 0x136   : > { %v401_v34 = vpop.f32.mrb[1].mxu0  ;;  %v427_v35 = vsel %vm423_vm7, %v399_v33, 0.0 }
 0x137   : > { %v403_v36 = vpop.f32.mrb[2].mxu0  ;;  %v428_v37 = vsel %vm424_vm8, %v401_v34, 0.0 }
 0x138   : > { %v429_v38 = vsel %vm425_vm9, %v403_v36, 0.0  ;;  %v405_v39 = vpop.f32.mrb[3].mxu0  ;;  %v431_v40 = vadd.f32 %v428_v37, %v427_v35 }
 0x139   : > { %v430_v41 = vsel %vm426_vm10, %v405_v39, 0.0 }
 0x13a   : > { %432 = vadd.xlane.f32.xlu1 %v431_v40  ;;  %v434_v42 = vadd.f32 %v430_v41, %v429_v38 }
 0x13e   : > { %435 = vadd.xlane.f32.xlu1 %v434_v42 }
 0x1c7   : > { %v433_v43 = vpop.xlane.xlu1 %432 }
 0x1c8   : > { %v705_v44 = vclamps-f32 %v433_v43, 1.0 }
 0x1ca   : > { %v441_v45 = vmul.f32 %v705_v44, %v705_v44  ;;  %v461_v59 = vmul.f32 0.87758255, %v705_v44 }
 0x1cb   : > { %v436_v46 = vpop.xlane.xlu1 %435 }
 0x1cc   : > { %v443_v47 = vsub.f32 1.0, %v441_v45  ;;  %v706_v48 = vclamps-f32 %v436_v46, 1.0 }
 0x1ce   : > { %v445_v49 = vmax.f32 %v443_v47, 0.0  ;;  %v442_v50 = vmul.f32 %v706_v48, %v706_v48  ;;  %v462_v6 = vmul.f32 0.87758255, %v706_v48 }
 0x1d0   : > { %815 = vrsqrt.f32 %v445_v49  ;;  %v444_v51 = vsub.f32 1.0, %v442_v50  ;;  %vm449_vm11 = vcmp.eq.f32.partialorder %v445_v49, inf  ;;  %v452_v55 = vand.u32 2147483648, %v445_v49  ;;  %v510_v50 = vld [vmem:[#allocation3] sm:$0xff] }
 0x1d1   : > { %vm451_vm12 = vcmp.eq.f32.partialorder %v445_v49, 0.0 }
 0x1d2   : > { %v446_v52 = vmax.f32 %v444_v51, 0.0 }
 0x1d4   : > { %817 = vrsqrt.f32 %v446_v52  ;;  %vm456_vm13 = vcmp.eq.f32.partialorder %v446_v52, inf  ;;  %v459_v63 = vand.u32 2147483648, %v446_v52  ;;  %vm458_vm14 = vcmp.eq.f32.partialorder %v446_v52, 0.0 }
 0x1da   : > { %v816_v53 = vpop.eup %815 }
 0x1db   : > { %v448_v54 = vmul.f32 %v816_v53, %v445_v49 }
 0x1dd   : > { %v450_v56 = vsel %vm449_vm11, %v445_v49, %v448_v54 }
 0x1de   : > { %v453_v57 = vsel %vm451_vm12, %v452_v55, %v450_v56  ;;  %v818_v58 = vpop.eup %817  ;;  %v511_v55 = vld [vmem:[#allocation3 + $0x8] sm:$0xff] }
 0x1df   : > { %v463_v60 = vmul.f32 0.47942555, %v453_v57  ;;  %v455_v61 = vmul.f32 %v818_v58, %v446_v52 }
 0x1e1   : > { %v465_v62 = vsub.f32 %v461_v59, %v463_v60  ;;  %v457_v0 = vsel %vm456_vm13, %v446_v52, %v455_v61 }
 0x1e2   : > { %v460_v3 = vsel %vm458_vm14, %v459_v63, %v457_v0 }
 0x1e3   : > { %v485_v2 = vmul.f32 30.0, %v465_v62  ;;  %v467_v4 = vsel %vm423_vm7, %v465_v62, %v399_v33  ;;  %v468_v5 = vsel %vm424_vm8, %v465_v62, %v401_v34  ;;  %v464_v7 = vmul.f32 0.47942555, %v460_v3 }
 0x1e4   : > { %v471_v8 = vmul.f32 30.0, %v467_v4  ;;  %v472_v9 = vmul.f32 30.0, %v468_v5 }
 0x1e5   : > { %v487_v10 = vsel %vm1108_vm3, %v485_v2, 0.0  ;;  %v466_v12 = vsub.f32 %v462_v6, %v464_v7 }
 0x1e6   : > { %v489_v11 = vadd.f32 %v487_v10, %v483_v1  ;;  %v496_v13 = vmax.f32 %v471_v8, %v472_v9 }
 0x1e7   : > { %v486_v15 = vmul.f32 30.0, %v466_v12  ;;  %v469_v18 = vsel %vm425_vm9, %v466_v12, %v403_v36  ;;  %v470_v19 = vsel %vm426_vm10, %v466_v12, %v405_v39 }
 0x1e8   : > { %497 = vmax.xlane.f32.xlu0 %v496_v13  ;;  %492 = vst.msk [vmem:[#allocation4] sm:$0xff] %vm491_vm15, %v489_v11  ;;  %v473_v20 = vmul.f32 30.0, %v469_v18  ;;  %v474_v16 = vmul.f32 30.0, %v470_v19 }
 0x1e9   : > { %v488_v21 = vsel %vm1112_vm6, %v486_v15, 0.0 }
 0x1ea   : > { %v490_v22 = vadd.f32 %v488_v21, %v484_v14  ;;  %v499_v23 = vmax.f32 %v473_v20, %v474_v16 }
 0x1ec   : > { %500 = vmax.xlane.f32.xlu1 %v499_v23  ;;  %493 = vst.msk [vmem:[#allocation4 + $0x8] sm:$0xff] %vm491_vm15, %v490_v22 }
 0x1ef   : > { %v562_v2 = vld [vmem:[#allocation4] sm:$0xff] (!%p707_p10) }
 0x1f3   : > { %v563_v5 = vld [vmem:[#allocation4 + $0x8] sm:$0xff] (!%p707_p10) }
 0x275   : > { %v498_v25 = vpop.xlane.xlu0 %497 }
 0x276   : > { %v502_v26 = vmax.f32 %v494_v24, %v498_v25 }
 0x278   : > { %v504_v27 = vsub.f32 %v494_v24, %v502_v26  ;;  %546 = vst.msk [vmem:[#allocation2] sm:$0xff] %vm491_vm15, %v502_v26  ;;  %516 = vperm.xlu1 %789, %v502_v26  }
 0x279   : > { %v501_v29 = vpop.xlane.xlu1 %500 }
 0x27a   : > { %v503_v30 = vmax.f32 %v495_v28, %v501_v29  ;;  %v506_v47 = vmul.f32 1.442695, %v504_v27 }
 0x27c   : > { %v505_v31 = vsub.f32 %v495_v28, %v503_v30  ;;  %547 = vst.msk [vmem:[#allocation2 + $0x8] sm:$0xff] %vm491_vm15, %v503_v30  ;;  %521 = vperm.xlu1 %789, %v503_v30  }
 0x27e   : > { %v508_v48 = vmul.f32 1.442695, %v505_v31 }
 0x27f   : > { %v552_v62 = vld [vmem:[#allocation2] sm:$0xff] (!%p707_p10) }
 0x283   : > { %v553_v1 = vld [vmem:[#allocation2 + $0x8] sm:$0xff] (!%p707_p10) }
 0x2f7   : > { %v517_v17 = vpop.permute.xlu1 %516 }
 0x2f8   : > { %v524_v32 = vsub.f32 %v471_v8, %v517_v17  ;;  %v525_v33 = vsub.f32 %v472_v9, %v517_v17 }
 0x2fa   : > { %v528_v34 = vmul.f32 1.442695, %v524_v32  ;;  %v530_v35 = vmul.f32 1.442695, %v525_v33 }
 0x2fb   : > { %v522_v36 = vpop.permute.xlu1 %521 }
 0x2fc   : > { %819 = vpow2.f32 %v528_v34  ;;  %v526_v37 = vsub.f32 %v473_v20, %v522_v36  ;;  %v527_v38 = vsub.f32 %v474_v16, %v522_v36 }
 0x2fd   : > { %821 = vpow2.f32 %v530_v35 }
 0x2fe   : > { %v532_v39 = vmul.f32 1.442695, %v526_v37  ;;  %v534_v40 = vmul.f32 1.442695, %v527_v38 }
 0x300   : > { %823 = vpow2.f32 %v532_v39 }
 0x301   : > { %825 = vpow2.f32 %v534_v40 }
 0x302   : > { %827 = vpow2.f32 %v506_v47 }
 0x303   : > { %829 = vpow2.f32 %v508_v48 }
 0x306   : > { %v820_v41 = vpop.eup %819 }
 0x307   : > { %v822_v42 = vpop.eup %821 }
 0x308   : > { %v536_v43 = vadd.f32 %v822_v42, %v820_v41 }
 0x30a   : > { %537 = vadd.xlane.f32.xlu1 %v536_v43  ;;  %v824_v44 = vpop.eup %823 }
 0x30b   : > { %v826_v45 = vpop.eup %825 }
 0x30c   : > { %v539_v46 = vadd.f32 %v826_v45, %v824_v44  ;;  %v828_v49 = vpop.eup %827 }
 0x30d   : > { %v512_v51 = vmul.f32 %v828_v49, %v510_v50  ;;  %v830_v53 = vpop.eup %829 }
 0x30e   : > { %540 = vadd.xlane.f32.xlu0 %v539_v46  ;;  %v513_v56 = vmul.f32 %v830_v53, %v511_v55 }
 0x397   : > { %v538_v52 = vpop.xlane.xlu1 %537 }
 0x398   : > { %v542_v54 = vadd.f32 %v538_v52, %v512_v51  ;;  %551 = sbr.rel (%p707_p10) target bundleno = 952 (0x3b8), region = 44 }
 0x39a   : > { %544 = vst.msk [vmem:[#allocation3] sm:$0xff] %vm491_vm15, %v542_v54 }
 0x39b   : > { %v541_v57 = vpop.xlane.xlu0 %540 }
 0x39c   : > { %v543_v58 = vadd.f32 %v541_v57, %v513_v56 }
 0x39e   : > { %545 = vst.msk [vmem:[#allocation3 + $0x8] sm:$0xff] %vm491_vm15, %v543_v58 }
 0x3a1   : > { %v554_v59 = vld [vmem:[#allocation3] sm:$0xff] }
 0x3a2   : > { %831 = vlog2.f32 %v554_v59 }
 0x3a5   : > { %v555_v60 = vld [vmem:[#allocation3 + $0x8] sm:$0xff] }
 0x3a6   : > { %833 = vlog2.f32 %v555_v60 }
 0x3ac   : > { %v832_v61 = vpop.eup %831 }
 0x3ad   : > { %v557_v0 = vmul.f32 0.6931472, %v832_v61 }
 0x3af   : > { %v560_v4 = vadd.f32 %v557_v0, %v552_v62 }
 0x3b0   : > { %v834_v63 = vpop.eup %833 }
 0x3b1   : > { %v559_v3 = vmul.f32 0.6931472, %v834_v63  ;;  %v564_v7 = vsub.f32 %v560_v4, %v562_v2 }
 0x3b3   : > { %v561_v6 = vadd.f32 %v559_v3, %v553_v1  ;;  %566 = vst.msk [vmem:[%s1093_s28] sm:$0xff] %vm491_vm15, %v564_v7 }
 0x3b5   : > { %v565_v8 = vsub.f32 %v561_v6, %v563_v5 }
 0x3b7   : > { %567 = vst.msk [vmem:[%s1093_s28 + $0x8] sm:$0xff] %vm491_vm15, %v565_v8 }
 0x3b8 PF: > { %s16_s19 = sadd.s32 1, %s931_s19   ;;  %s1207_s12 = smov %s907_s13 }
 0x3b9   : > { %p13_p6 = scmp.ge.s32.totalorder %s16_s19, 6   ;;  %s1208_s13 = smov %s911_s14 }
 0x3ba   : > { %s1209_s14 = smov %s1018_s26  ;;  %s1210_s15 = smov %s923_s17 }
 0x3bb   : > { %s1211_s16 = smov %s927_s18  ;;  %s1212_s17 = smov %s1215_s21 }
 0x3bc   : > { %s1213_s18 = smov %s1219_s22  ;;  %15 = sbr.rel (!%p13_p6) target bundleno = 5 (0x5), region = 86 }
 0x3c3   :  { %590 = vsyncpa [#allocation6], 1 }
 0x3c4   :  { %592 = vsyncpa [#allocation6 + $0x1], 1 }

</bundles_post_ra>
